<compile_context>
chip_gen: v5e
topology: v5e:2x2
jax: 0.10.0
libtpu: 0.0.40
codegen_flags: <defaults>
</compile_context>

<pallas_src>
import jax
import jax.numpy as jnp
from jax.experimental import pallas as pl
from jax.experimental.pallas import tpu as pltpu

EPS = 1e-6  # LayerNorm eps from the reference module


def _round_up(n, m):
    return ((n + m - 1) // m) * m


# ----------------------------- Pallas kernel -----------------------------

def layernorm_kernel(x_ref, a_ref, b_ref, o_ref):
    # One (TILE_R, D) row-tile. torch semantics: unbiased std, a*(x-mean)/(std+eps)+b
    x = x_ref[...]                                            # (TILE_R, D) f32
    d = x.shape[-1]
    mean = jnp.mean(x, axis=-1, keepdims=True)                # (TILE_R, 1)
    xc = x - mean
    var = jnp.sum(xc * xc, axis=-1, keepdims=True) * (1.0 / (d - 1))  # unbiased
    std = jnp.sqrt(var)
    inv = pl.reciprocal(std + EPS, approx=True)               # EUP slot, not VPU divide
    o_ref[...] = a_ref[...] * (xc * inv) + b_ref[...]


# ----------------------------- wrapper -----------------------------

def pallas_layernorm(x, a_2, b_2, *, tile_r=256):
    """LayerNorm over the last dim of x. x: (..., D); a_2, b_2: (D,)."""
    orig_shape = x.shape
    D = orig_shape[-1]
    x2d = x.reshape(-1, D).astype(jnp.float32)
    R = x2d.shape[0]

    # Row tile: multiple of 8 sublanes, capped at tile_r; pad rows to a full tile.
    tr = min(tile_r, _round_up(R, 8))
    Rp = _round_up(R, tr)
    if Rp != R:
        x2d = jnp.pad(x2d, ((0, Rp - R), (0, 0)))

    out = pl.pallas_call(
        layernorm_kernel,
        out_shape=jax.ShapeDtypeStruct((Rp, D), jnp.float32),
        grid=(Rp // tr,),
        in_specs=[
            pl.BlockSpec((tr, D), lambda i: (i, 0)),   # activation row-tile
            pl.BlockSpec((1, D), lambda i: (0, 0)),    # gamma (a_2), same block every step
            pl.BlockSpec((1, D), lambda i: (0, 0)),    # beta  (b_2)
        ],
        out_specs=pl.BlockSpec((tr, D), lambda i: (i, 0)),
        compiler_params=pltpu.CompilerParams(
            dimension_semantics=("parallel",),         # rows are independent -> megacore
        ),
    )(x2d,
      a_2.reshape(1, D).astype(jnp.float32),
      b_2.reshape(1, D).astype(jnp.float32))

    return out[:R].reshape(orig_shape)


# ----------------------------- pure-JAX reference -----------------------------

def layernorm_ref(x, a_2, b_2):
    mean = jnp.mean(x, axis=-1, keepdims=True)
    xc = x - mean
    var = jnp.sum(xc * xc, axis=-1, keepdims=True) / (x.shape[-1] - 1)  # unbiased
    std = jnp.sqrt(var)
    return a_2 * xc / (std + EPS) + b_2


# ----------------------------- demo -----------------------------

if __name__ == "__main__":
    key = jax.random.PRNGKey(0)
    kx, ka, kb, ky = jax.random.split(key, 4)

    # Small shape consistent with the module: (batch, seq, features), features
    # chosen lane-dense (multiple of 128) per the perf review.
    B, T, D = 2, 8, 128
    x = jax.random.normal(kx, (B, T, D), jnp.float32)
    a_2 = 1.0 + 0.1 * jax.random.normal(ka, (D,), jnp.float32)
    b_2 = 0.1 * jax.random.normal(kb, (D,), jnp.float32)

    out = jax.block_until_ready(pallas_layernorm(x, a_2, b_2))
    ref = layernorm_ref(x, a_2, b_2)
    assert out.shape == x.shape and out.dtype == jnp.float32
    assert bool(jnp.all(jnp.isfinite(out)))
    assert bool(jnp.max(jnp.abs(out - ref)) < 2e-2), float(jnp.max(jnp.abs(out - ref)))

    # Larger input to exercise the row-tiled multi-step grid + row padding
    # (2400 rows -> 256-row tiles, 10 grid steps, software-pipelined DMA).
    y = jax.random.normal(ky, (4, 600, D), jnp.float32)
    out2 = jax.block_until_ready(pallas_layernorm(y, a_2, b_2))
    ref2 = layernorm_ref(y, a_2, b_2)
    assert out2.shape == y.shape
    assert bool(jnp.all(jnp.isfinite(out2)))
    assert bool(jnp.max(jnp.abs(out2 - ref2)) < 2e-2)

    print("KERNEL_OK")
</pallas_src>

<mosaic_0001>
module attributes {stable_mosaic.version = 11 : i64} {
  func.func @layernorm_kernel(%arg0: i32, %arg1: memref<16x128xf32, #tpu.memory_space<vmem>>, %arg2: memref<1x128xf32, #tpu.memory_space<vmem>>, %arg3: memref<1x128xf32, #tpu.memory_space<vmem>>, %arg4: memref<16x128xf32, #tpu.memory_space<vmem>>) attributes {dimension_semantics = [#tpu.dimension_semantics<parallel>], iteration_bounds = array<i64: 1>, scalar_prefetch = 0 : i64, scratch_operands = 0 : i64, tpu.core_type = #tpu.core_type<tc>, window_params = [{transform_indices = @transform_0, window_bounds = array<i64: 16, 128>}, {pipeline_mode = #tpu.pipeline_mode<synchronous>, transform_indices = @transform_1, window_bounds = array<i64: 1, 128>}, {pipeline_mode = #tpu.pipeline_mode<synchronous>, transform_indices = @transform_2, window_bounds = array<i64: 1, 128>}, {transform_indices = @transform_3, window_bounds = array<i64: 16, 128>}]} {
    %c0 = arith.constant 0 : index
    %c0_0 = arith.constant 0 : index
    %0 = vector.load %arg1[%c0, %c0_0] : memref<16x128xf32, #tpu.memory_space<vmem>>, vector<16x128xf32>
    %cst = arith.constant dense<0.000000e+00> : vector<16xf32>
    %1 = vector.multi_reduction <add>, %0, %cst [1] : vector<16x128xf32> to vector<16xf32>
    %2 = vector.shape_cast %1 : vector<16xf32> to vector<16x1xf32>
    %cst_1 = arith.constant 1.280000e+02 : f32
    %3 = vector.broadcast %cst_1 : f32 to vector<16x1xf32>
    %4 = arith.divf %2, %3 : vector<16x1xf32>
    %5 = vector.broadcast %4 : vector<16x1xf32> to vector<16x128xf32>
    %6 = arith.subf %0, %5 : vector<16x128xf32>
    %7 = arith.mulf %6, %6 : vector<16x128xf32>
    %cst_2 = arith.constant dense<0.000000e+00> : vector<16xf32>
    %8 = vector.multi_reduction <add>, %7, %cst_2 [1] : vector<16x128xf32> to vector<16xf32>
    %9 = vector.shape_cast %8 : vector<16xf32> to vector<16x1xf32>
    %cst_3 = arith.constant 0.00787401571 : f32
    %10 = vector.broadcast %cst_3 : f32 to vector<16x1xf32>
    %11 = arith.mulf %9, %10 : vector<16x1xf32>
    %12 = math.sqrt %11 : vector<16x1xf32>
    %cst_4 = arith.constant 9.99999997E-7 : f32
    %13 = vector.broadcast %cst_4 : f32 to vector<16x1xf32>
    %14 = arith.addf %12, %13 : vector<16x1xf32>
    %15 = tpu.reciprocal %14 {approx = true} : vector<16x1xf32> -> vector<16x1xf32>
    %c0_5 = arith.constant 0 : index
    %c0_6 = arith.constant 0 : index
    %16 = vector.load %arg2[%c0_5, %c0_6] : memref<1x128xf32, #tpu.memory_space<vmem>>, vector<1x128xf32>
    %17 = vector.broadcast %15 : vector<16x1xf32> to vector<16x128xf32>
    %18 = arith.mulf %6, %17 : vector<16x128xf32>
    %19 = vector.broadcast %16 : vector<1x128xf32> to vector<16x128xf32>
    %20 = arith.mulf %19, %18 : vector<16x128xf32>
    %c0_7 = arith.constant 0 : index
    %c0_8 = arith.constant 0 : index
    %21 = vector.load %arg3[%c0_7, %c0_8] : memref<1x128xf32, #tpu.memory_space<vmem>>, vector<1x128xf32>
    %22 = vector.broadcast %21 : vector<1x128xf32> to vector<16x128xf32>
    %23 = arith.addf %20, %22 : vector<16x128xf32>
    %c0_9 = arith.constant 0 : index
    %c0_10 = arith.constant 0 : index
    %24 = vector.load %arg4[%c0_9, %c0_10] : memref<16x128xf32, #tpu.memory_space<vmem>>, vector<16x128xf32>
    tpu.vector_store %arg4[%c0_9, %c0_10], %23 {strides = array<i32>} : memref<16x128xf32, #tpu.memory_space<vmem>>, vector<16x128xf32>,
    return
  }
  func.func @transform_0(%arg0: i32) -> (i32, i32) {
    %c0_i32 = arith.constant 0 : i32
    %c0_i32_0 = arith.constant 0 : i32
    return %arg0, %c0_i32 : i32, i32
  }
  func.func @transform_1(%arg0: i32) -> (i32, i32) {
    %c0_i32 = arith.constant 0 : i32
    %c0_i32_0 = arith.constant 0 : i32
    %c0_i32_1 = arith.constant 0 : i32
    return %c0_i32, %c0_i32_0 : i32, i32
  }
  func.func @transform_2(%arg0: i32) -> (i32, i32) {
    %c0_i32 = arith.constant 0 : i32
    %c0_i32_0 = arith.constant 0 : i32
    %c0_i32_1 = arith.constant 0 : i32
    return %c0_i32, %c0_i32_0 : i32, i32
  }
  func.func @transform_3(%arg0: i32) -> (i32, i32) {
    %c0_i32 = arith.constant 0 : i32
    %c0_i32_0 = arith.constant 0 : i32
    return %arg0, %c0_i32 : i32, i32
  }
}

</mosaic_0001>

<bundles_post_ra>
// kernel: tpu_custom_call.1
= control target key start
LH: loop header
LB: loop body
LE: loop exit
PB: predicated region body
PF: predicated region fallthrough
CT: control target
= control target key end

     0   :  { %8 = vsyncpa [#allocation3], 0  ;;  %s274_s0 = inlined_call_operand.hbm [shape: f32[16,128], index: 0, kind: input, shape index: {}]   ;;  %s275_s1 = inlined_call_operand.hbm [shape: f32[1,128], index: 1, kind: input, shape index: {}]   ;;  %s276_s2 = inlined_call_operand.vmem [shape: f32[1,128], index: 2, kind: input, shape index: {}]   ;;  %s277_s3 = inlined_call_operand.hbm [shape: f32[16,128], index: 3, kind: output, shape index: {}]  }
   0x1   :  { %9 = vsyncpa [#allocation6], 0 }
   0x2   :  { %10 = vsyncpa [#allocation4], 0  ;;  %s15_s14 = sshll.u32 %s274_s0, 4  ;;  %s230_s15 = smov [#allocation2]   ;;  %s16_s14 = int_to_ptr.hbm [resolvable:$true] %s15_s14 }
   0x3   :  { %s17_s16 = sshll.u32 %s230_s15, 4  ;;  %s29_s19 = sshll.u32 %s275_s1, 4  ;;  %s18_s16 = int_to_ptr.vmem [resolvable:$true] %s17_s16  ;;  %s30_s19 = int_to_ptr.hbm [resolvable:$true] %s29_s19 }
   0x4   :  { %s231_s20 = smov 128   ;;  %s232_s21 = smov 8  }
   0x5   :  { %23 = dma.hbm_to_vmem [thread:$0]  %s16_s14, 256, %s18_s16, [#allocation3], %s231_s20, %s231_s20, %s232_s21  }
   0x6   :  { %s233_s22 = smov [#allocation5]  }
   0x7   :  { %s31_s23 = sshll.u32 %s233_s22, 4  ;;  %s32_s23 = int_to_ptr.vmem [resolvable:$true] %s31_s23 }
   0x8   :  { %34 = dma.hbm_to_vmem [thread:$0]  %s30_s19, 16, %s32_s23, [#allocation6]  }
   0x9   :  { %224 = dma.done.wait [#allocation3], 256  }
   0xa   :  { %225 = vsyncadd [#allocation3], 4294967040 }
   0xb   :  { %226 = dma.done.wait [#allocation6], 16  }
   0xc   :  { %227 = vsyncadd [#allocation6], 4294967280  ;;  %v45_v0 = vld [vmem:[#allocation2] sm:$0xff]  ;;  %v46_v1 = vld [vmem:[#allocation2 + $0x8] sm:$0xff]  ;;  %v234_v2 = vmov 128.0   ;;  %s235_s24 = smov [#allocation7]  }
   0xd   :  { %47 = vadd.xlane.f32.xlu0 %v45_v0  ;;  %142 = vrcp.f32 %v234_v2  ;;  %v140_v42 = vld [vmem:[#allocation5] ss:$0 sm:$0xff]  ;;  %v141_v46 = vld [vmem:[%s276_s2] ss:$0 sm:$0xff]  ;;  %s118_s25 = sshll.u32 %s235_s24, 4  ;;  %s120_s28 = sshll.u32 %s277_s3, 4  ;;  %s119_s25 = int_to_ptr.vmem [resolvable:$true] %s118_s25  ;;  %s121_s28 = int_to_ptr.hbm [resolvable:$true] %s120_s28 }
  0x13   :  { %v143_v3 = vpop.eup %142 }
  0x14   :  { %v52_v4 = vmul.f32 128.0, %v143_v3  ;;  %vm56_vm0 = vweird.f32 %v143_v3 }
  0x15   :  { %49 = vadd.xlane.f32.xlu0 %v46_v1 }
  0x16   :  { %v53_v5 = vsub.f32 1.0, %v52_v4 }
  0x18   :  { %v54_v6 = vmul.f32 %v143_v3, %v53_v5 }
  0x1a   :  { %v55_v7 = vadd.f32 %v143_v3, %v54_v6 }
  0x1c   :  { %v57_v8 = vsel %vm56_vm0, %v143_v3, %v55_v7 }
  0x80   :  { %v48_v9 = vpop.xlane.xlu0 %47 }
  0x81   :  { %v58_v10 = vmul.f32 %v57_v8, %v48_v9 }
  0x83   :  { %v60_v11 = vsub.f32 %v45_v0, %v58_v10 }
  0x85   :  { %v62_v12 = vmul.f32 %v60_v11, %v60_v11 }
  0x87   :  { %64 = vadd.xlane.f32.xlu1 %v62_v12 }
  0x88   :  { %v50_v13 = vpop.xlane.xlu0 %49 }
  0x89   :  { %v59_v14 = vmul.f32 %v57_v8, %v50_v13 }
  0x8b   :  { %v61_v15 = vsub.f32 %v46_v1, %v59_v14 }
  0x8d   :  { %v63_v16 = vmul.f32 %v61_v15, %v61_v15 }
  0x8f   :  { %66 = vadd.xlane.f32.xlu1 %v63_v16 }
  0xfa   :  { %v65_v17 = vpop.xlane.xlu1 %64 }
  0xfb   :  { %v68_v18 = vmul.f32 0.007874016, %v65_v17 }
  0xfd   :  { %144 = vrsqrt.f32 %v68_v18  ;;  %vm77_vm1 = vcmp.eq.f32.partialorder %v68_v18, inf  ;;  %v80_v31 = vand.u32 2147483648, %v68_v18  ;;  %vm79_vm2 = vcmp.eq.f32.partialorder %v68_v18, 0.0 }
 0x102   :  { %v67_v19 = vpop.xlane.xlu1 %66 }
 0x103   :  { %v145_v20 = vpop.eup %144  ;;  %v69_v21 = vmul.f32 0.007874016, %v67_v19 }
 0x104   :  { %v71_v22 = vmul.f32 %v145_v20, %v68_v18 }
 0x105   :  { %146 = vrsqrt.f32 %v69_v21  ;;  %vm89_vm3 = vcmp.eq.f32.partialorder %v69_v21, inf  ;;  %v92_v39 = vand.u32 2147483648, %v69_v21  ;;  %vm91_vm4 = vcmp.eq.f32.partialorder %v69_v21, 0.0 }
 0x106   :  { %v72_v23 = vmul.f32 %v145_v20, %v71_v22 }
 0x108   :  { %v73_v24 = vmul.f32 0.5, %v72_v23 }
 0x10a   :  { %v74_v25 = vsub.f32 1.5, %v73_v24 }
 0x10b   :  { %v147_v26 = vpop.eup %146 }
 0x10c   :  { %v75_v27 = vmul.f32 %v145_v20, %v74_v25  ;;  %v83_v28 = vmul.f32 %v147_v26, %v69_v21 }
 0x10e   :  { %v76_v29 = vmul.f32 %v75_v27, %v68_v18  ;;  %v84_v30 = vmul.f32 %v147_v26, %v83_v28 }
 0x110   :  { %v85_v32 = vmul.f32 0.5, %v84_v30  ;;  %v78_v33 = vsel %vm77_vm1, %v68_v18, %v76_v29 }
 0x111   :  { %v81_v34 = vsel %vm79_vm2, %v80_v31, %v78_v33 }
 0x112   :  { %v86_v35 = vsub.f32 1.5, %v85_v32  ;;  %v94_v36 = vadd.f32 1e-06, %v81_v34 }
 0x114   :  { %v87_v37 = vmul.f32 %v147_v26, %v86_v35  ;;  %148 = vrcp.f32 %v94_v36 }
 0x116   :  { %v88_v38 = vmul.f32 %v87_v37, %v69_v21 }
 0x118   :  { %v90_v40 = vsel %vm89_vm3, %v69_v21, %v88_v38 }
 0x119   :  { %v93_v41 = vsel %vm91_vm4, %v92_v39, %v90_v40 }
 0x11a   :  { %v149_v43 = vpop.eup %148  ;;  %v95_v44 = vadd.f32 1e-06, %v93_v41 }
 0x11b   :  { %v99_v45 = vmul.f32 %v149_v43, %v60_v11 }
 0x11c   :  { %150 = vrcp.f32 %v95_v44 }
 0x11d   :  { %v104_v47 = vmul.f32 %v140_v42, %v99_v45 }
 0x11f   :  { %v110_v48 = vadd.f32 %v141_v46, %v104_v47 }
 0x121   :  { %112 = vst [vmem:[#allocation7] sm:$0xff] %v110_v48 }
 0x122   :  { %v151_v49 = vpop.eup %150 }
 0x123   :  { %v100_v50 = vmul.f32 %v151_v49, %v61_v15 }
 0x125   :  { %v105_v51 = vmul.f32 %v140_v42, %v100_v50 }
 0x127   :  { %v111_v52 = vadd.f32 %v141_v46, %v105_v51 }
 0x129   :  { %113 = vst [vmem:[#allocation7 + $0x8] sm:$0xff] %v111_v52 }
 0x12a   :  { %126 = dma.vmem_to_hbm [thread:$0]  %s119_s25, 256, %s121_s28, [#allocation4], %s231_s20, %s231_s20, %s232_s21  }
 0x12b   :  { %228 = dma.done.wait [#allocation4], 256  }
 0x12c   :  { %229 = vsyncadd [#allocation4], 4294967040 }
 0x12d   :  { %131 = vsyncpa [#allocation3], 1 }
 0x12e   :  { %132 = vsyncpa [#allocation6], 1 }
 0x12f   :  { %133 = vsyncpa [#allocation4], 1 }

</bundles_post_ra>
